<compile_context>
chip_gen: v6e
topology: v6e:2x2x1
jax: 0.10.0
libtpu: 0.0.40
codegen_flags: <defaults>
</compile_context>

<pallas_src>
import jax
import jax.numpy as jnp
from jax.experimental import pallas as pl
from jax.experimental.pallas import tpu as pltpu

_LANE = 128
_SUBLANE = 8


# ---------------------------------------------------------------------------
# Kernels
# ---------------------------------------------------------------------------
def mlp_kernel(x_ref, w1_ref, b1_ref, w2_ref, b2_ref, o_ref):
    """Whole-row MLP: the x tile sees the full D_in."""
    # Cast x to the weight dtype *in kernel* (no extra HBM convert pass);
    # MXU accumulates in f32.
    x = x_ref[...].astype(w1_ref.dtype)
    h = jnp.dot(x, w1_ref[...], preferred_element_type=jnp.float32)
    # Bias + ReLU in f32 on the VPU (biases are stored f32; v5e-safe).
    h = jnp.maximum(h + b1_ref[...], 0.0)
    o = jnp.dot(h.astype(w2_ref.dtype), w2_ref[...],
                preferred_element_type=jnp.float32)
    o_ref[...] = (o + b2_ref[...]).astype(o_ref.dtype)


def mlp_kernel_ktiled(x_ref, w1_ref, b1_ref, w2_ref, b2_ref, o_ref, h_acc):
    """K-tiled MLP: the fc1 contraction over D_in is split across grid axis 1
    with an f32 VMEM accumulator; bias/ReLU/fc2/store run on the last K step."""
    k = pl.program_id(1)

    @pl.when(k == 0)
    def _():
        h_acc[...] = jnp.zeros_like(h_acc)

    x = x_ref[...].astype(w1_ref.dtype)
    h_acc[...] += jnp.dot(x, w1_ref[...], preferred_element_type=jnp.float32)

    @pl.when(k == pl.num_programs(1) - 1)
    def _():
        h = jnp.maximum(h_acc[...] + b1_ref[...], 0.0)
        o = jnp.dot(h.astype(w2_ref.dtype), w2_ref[...],
                    preferred_element_type=jnp.float32)
        o_ref[...] = (o + b2_ref[...]).astype(o_ref.dtype)


# ---------------------------------------------------------------------------
# Wrapper
# ---------------------------------------------------------------------------
def _round_up(x, m):
    return ((x + m - 1) // m) * m


def _pick_block_k(d_in, bytes_per_k_row, budget_bytes):
    """Largest multiple-of-128 divisor of d_in whose W1 K-slice fits budget."""
    if d_in % _LANE != 0:
        return None
    bk = (budget_bytes // max(bytes_per_k_row, 1)) // _LANE * _LANE
    bk = min(bk, d_in)
    while bk >= _LANE and d_in % bk != 0:
        bk -= _LANE
    return bk if _LANE <= bk < d_in else None


def two_layer_net(x, w1t, b1, w2t, b2, *, block_b=512, block_k=None,
                  out_dtype=jnp.float32, no_grid_max_b=128):
    """Fused Linear->ReLU->Linear forward.

    x:   [B, D_in]   (any float dtype; cast to weight dtype in-kernel)
    w1t: [D_in, H]   (pre-transposed; stored in compute dtype at init)
    b1:  [1, H]      (float32)
    w2t: [H, D_out]  (pre-transposed; stored in compute dtype at init)
    b2:  [1, D_out]  (float32)
    """
    B, D_in = x.shape
    D_in_w, H = w1t.shape
    H2, D_out = w2t.shape
    assert D_in == D_in_w and H == H2, "weight shapes inconsistent with x"

    w_bytes = jnp.dtype(w1t.dtype).itemsize
    x_bytes = jnp.dtype(x.dtype).itemsize
    o_bytes = jnp.dtype(out_dtype).itemsize

    cost = pl.CostEstimate(
        flops=int(2 * B * (D_in * H + H * D_out)),
        transcendentals=0,
        bytes_accessed=int(B * D_in * x_bytes
                           + (D_in * H + H * D_out) * w_bytes
                           + (H + D_out) * 4
                           + B * D_out * o_bytes),
    )
    out_shape = jax.ShapeDtypeStruct((B, D_out), out_dtype)

    # --- Small problems: one grid-less invocation, everything VMEM-resident,
    # no pipeline machinery at all.
    # TODO(synk): if a tiny D_out (<128) shape is hot in serving, pad/fold the
    # output feature dim to a lane-dense (multiple-of-128) slab at the wrapper.
    if B <= no_grid_max_b and block_k is None:
        return pl.pallas_call(
            mlp_kernel,
            out_shape=out_shape,
            in_specs=[pl.BlockSpec(memory_space=pltpu.MemorySpace.VMEM)] * 5,
            out_specs=pl.BlockSpec(memory_space=pltpu.MemorySpace.VMEM),
            cost_estimate=cost,
        )(x, w1t, b1, w2t, b2)

    # --- Batch tile: as large as block_b allows, but always >= 2 grid steps so
    # the "parallel" batch axis actually feeds both v7x TensorCores.
    tb = min(block_b, _round_up(pl.cdiv(B, 2), _SUBLANE))
    tb = max(tb, _SUBLANE)
    nb = pl.cdiv(B, tb)

    # --- Auto K-tiling when resident weights would blow past VMEM
    # (mainly v7x: 64 MiB physical, 32 MiB scoped default).
    if block_k is None:
        weight_bytes = (D_in * H + H * D_out) * w_bytes
        if weight_bytes > 20 * 1024 * 1024:
            block_k = _pick_block_k(D_in, H * w_bytes, 8 * 1024 * 1024)

    single = pl.Buffered(buffer_count=1)  # grid-invariant operands: 1 buffer

    if block_k is None:
        # x/out tiles double-buffered, weights/biases single-buffered, plus the
        # (tb, H) f32 intermediate; 25% + 1 MiB headroom, never below the
        # 32 MiB scoped default, capped at v7x physical (64 MiB).
        vmem_bytes = (2 * tb * D_in * x_bytes
                      + 2 * tb * D_out * o_bytes
                      + (D_in * H + H * D_out) * w_bytes
                      + (H + D_out) * _SUBLANE * 4
                      + tb * H * 4)
        vmem_limit = min(max(int(vmem_bytes * 1.25) + (1 << 20),
                             32 * 1024 * 1024), 64 * 1024 * 1024)
        return pl.pallas_call(
            mlp_kernel,
            out_shape=out_shape,
            grid=(nb,),
            in_specs=[
                pl.BlockSpec((tb, D_in), lambda i: (i, 0)),
                pl.BlockSpec((D_in, H), lambda i: (0, 0), pipeline_mode=single),
                pl.BlockSpec((1, H), lambda i: (0, 0), pipeline_mode=single),
                pl.BlockSpec((H, D_out), lambda i: (0, 0), pipeline_mode=single),
                pl.BlockSpec((1, D_out), lambda i: (0, 0), pipeline_mode=single),
            ],
            out_specs=pl.BlockSpec((tb, D_out), lambda i: (i, 0)),
            compiler_params=pltpu.CompilerParams(
                dimension_semantics=("parallel",),
                vmem_limit_bytes=vmem_limit),
            cost_estimate=cost,
        )(x, w1t, b1, w2t, b2)

    # --- K-tiled path: batch axis "parallel", reduction axis last, "arbitrary".
    assert D_in % block_k == 0 and block_k % _LANE == 0, (
        "block_k must be a multiple of 128 that divides D_in")
    nk = D_in // block_k
    vmem_bytes = (2 * tb * block_k * x_bytes
                  + 2 * tb * D_out * o_bytes
                  + 2 * block_k * H * w_bytes
                  + H * D_out * w_bytes
                  + (H + D_out) * _SUBLANE * 4
                  + tb * H * 4)
    vmem_limit = min(max(int(vmem_bytes * 1.25) + (1 << 20),
                         32 * 1024 * 1024), 64 * 1024 * 1024)
    return pl.pallas_call(
        mlp_kernel_ktiled,
        out_shape=out_shape,
        grid=(nb, nk),
        in_specs=[
            pl.BlockSpec((tb, block_k), lambda i, k: (i, k)),
            pl.BlockSpec((block_k, H), lambda i, k: (k, 0)),
            pl.BlockSpec((1, H), lambda i, k: (0, 0), pipeline_mode=single),
            pl.BlockSpec((H, D_out), lambda i, k: (0, 0), pipeline_mode=single),
            pl.BlockSpec((1, D_out), lambda i, k: (0, 0), pipeline_mode=single),
        ],
        out_specs=pl.BlockSpec((tb, D_out), lambda i, k: (i, 0)),
        scratch_shapes=[pltpu.VMEM((tb, H), jnp.float32)],
        compiler_params=pltpu.CompilerParams(
            dimension_semantics=("parallel", "arbitrary"),
            vmem_limit_bytes=vmem_limit),
        cost_estimate=cost,
    )(x, w1t, b1, w2t, b2)


# ---------------------------------------------------------------------------
# Params / reference
# ---------------------------------------------------------------------------
def init_params(key, input_dim, hidden_dim, output_dim, *,
                param_dtype=jnp.float32):
    """torch.nn.Linear-style U(-1/sqrt(fan_in), ...) init. Weights are stored
    pre-transposed ([D_in, H], [H, D_out]) and already in the compute dtype
    (cast once here, never per forward); biases stay float32 and 2-D."""
    k1, k2, k3, k4 = jax.random.split(key, 4)
    lim1 = 1.0 / float(input_dim) ** 0.5
    lim2 = 1.0 / float(hidden_dim) ** 0.5
    w1t = jax.random.uniform(k1, (input_dim, hidden_dim), jnp.float32,
                             -lim1, lim1).astype(param_dtype)
    b1 = jax.random.uniform(k2, (1, hidden_dim), jnp.float32, -lim1, lim1)
    w2t = jax.random.uniform(k3, (hidden_dim, output_dim), jnp.float32,
                             -lim2, lim2).astype(param_dtype)
    b2 = jax.random.uniform(k4, (1, output_dim), jnp.float32, -lim2, lim2)
    return w1t, b1, w2t, b2


def reference(x, w1t, b1, w2t, b2):
    h = jnp.maximum(x @ w1t.astype(jnp.float32) + b1, 0.0)
    return h @ w2t.astype(jnp.float32) + b2


if __name__ == "__main__":
    net = jax.jit(
        two_layer_net,
        static_argnames=("block_b", "block_k", "out_dtype", "no_grid_max_b"))

    key = jax.random.PRNGKey(0)
    kx, kp, kx2, kp2, kx3, kp3 = jax.random.split(key, 6)

    # 1) Small-shape f32 check — grid-less path (module-consistent toy shapes).
    B, D_in, Hdim, D_out = 8, 64, 32, 16
    x = jax.random.normal(kx, (B, D_in), jnp.float32)
    params = init_params(kp, D_in, Hdim, D_out)
    out = jax.block_until_ready(net(x, *params))
    ref = reference(x, *params)
    assert out.shape == (B, D_out)
    assert jnp.allclose(out, ref, atol=1e-5, rtol=1e-5)

    # 2) Batch-tiled path: bf16 weights stored at init, in-kernel x cast,
    #    bf16 output, 2 parallel grid steps, single-buffered resident weights.
    B2, D_in2, H2, D_out2 = 1024, 256, 128, 128
    x2 = jax.random.normal(kx2, (B2, D_in2), jnp.float32)
    p2 = init_params(kp2, D_in2, H2, D_out2, param_dtype=jnp.bfloat16)
    out2 = jax.block_until_ready(
        net(x2, *p2, block_b=512, out_dtype=jnp.bfloat16))
    ref2 = reference(x2, *p2)
    rel2 = (jnp.linalg.norm(out2.astype(jnp.float32) - ref2)
            / jnp.linalg.norm(ref2))
    assert out2.shape == (B2, D_out2)
    assert rel2 < 5e-2

    # 3) K-tiled accumulator path (forced via block_k) with a partial last
    #    batch tile (B % tb != 0), f32 output.
    B3, D_in3, H3, D_out3 = 200, 512, 128, 128
    x3 = jax.random.normal(kx3, (B3, D_in3), jnp.float32)
    p3 = init_params(kp3, D_in3, H3, D_out3, param_dtype=jnp.bfloat16)
    out3 = jax.block_until_ready(net(x3, *p3, block_b=256, block_k=256))
    ref3 = reference(x3, *p3)
    rel3 = jnp.linalg.norm(out3 - ref3) / jnp.linalg.norm(ref3)
    assert out3.shape == (B3, D_out3)
    assert rel3 < 5e-2

    print("KERNEL_OK")
</pallas_src>

<mosaic_0001>
module attributes {stable_mosaic.version = 11 : i64} {
  func.func @mlp_kernel(%arg0: memref<8x64xf32, #tpu.memory_space<vmem>>, %arg1: memref<64x32xf32, #tpu.memory_space<vmem>>, %arg2: memref<1x32xf32, #tpu.memory_space<vmem>>, %arg3: memref<32x16xf32, #tpu.memory_space<vmem>>, %arg4: memref<1x16xf32, #tpu.memory_space<vmem>>, %arg5: memref<8x16xf32, #tpu.memory_space<vmem>>) attributes {dimension_semantics = [], scalar_prefetch = 0 : i64, scratch_operands = 0 : i64, tpu.core_type = #tpu.core_type<tc>} {
    %c0 = arith.constant 0 : index
    %c0_0 = arith.constant 0 : index
    %0 = vector.load %arg0[%c0, %c0_0] : memref<8x64xf32, #tpu.memory_space<vmem>>, vector<8x64xf32>
    %c0_1 = arith.constant 0 : index
    %c0_2 = arith.constant 0 : index
    %1 = vector.load %arg1[%c0_1, %c0_2] : memref<64x32xf32, #tpu.memory_space<vmem>>, vector<64x32xf32>
    %cst = arith.constant dense<0.000000e+00> : vector<8x32xf32>
    %2 = tpu.matmul %0, %1, %cst {dimension_numbers = #tpu.dot_dimension_numbers<[1], [0], [0], [1], [0, 0, 1, 1], [], []>} : vector<8x64xf32>, vector<64x32xf32>, vector<8x32xf32> -> vector<8x32xf32>
    %c0_3 = arith.constant 0 : index
    %c0_4 = arith.constant 0 : index
    %3 = vector.load %arg2[%c0_3, %c0_4] : memref<1x32xf32, #tpu.memory_space<vmem>>, vector<1x32xf32>
    %4 = vector.broadcast %3 : vector<1x32xf32> to vector<8x32xf32>
    %5 = arith.addf %2, %4 : vector<8x32xf32>
    %cst_5 = arith.constant 0.000000e+00 : f32
    %6 = vector.broadcast %cst_5 : f32 to vector<8x32xf32>
    %7 = arith.maximumf %5, %6 : vector<8x32xf32>
    %c0_6 = arith.constant 0 : index
    %c0_7 = arith.constant 0 : index
    %8 = vector.load %arg3[%c0_6, %c0_7] : memref<32x16xf32, #tpu.memory_space<vmem>>, vector<32x16xf32>
    %cst_8 = arith.constant dense<0.000000e+00> : vector<8x16xf32>
    %9 = tpu.matmul %7, %8, %cst_8 {dimension_numbers = #tpu.dot_dimension_numbers<[1], [0], [0], [1], [0, 0, 1, 1], [], []>} : vector<8x32xf32>, vector<32x16xf32>, vector<8x16xf32> -> vector<8x16xf32>
    %c0_9 = arith.constant 0 : index
    %c0_10 = arith.constant 0 : index
    %10 = vector.load %arg4[%c0_9, %c0_10] : memref<1x16xf32, #tpu.memory_space<vmem>>, vector<1x16xf32>
    %11 = vector.broadcast %10 : vector<1x16xf32> to vector<8x16xf32>
    %12 = arith.addf %9, %11 : vector<8x16xf32>
    %c0_11 = arith.constant 0 : index
    %c0_12 = arith.constant 0 : index
    %13 = vector.load %arg5[%c0_11, %c0_12] : memref<8x16xf32, #tpu.memory_space<vmem>>, vector<8x16xf32>
    tpu.vector_store %arg5[%c0_11, %c0_12], %12 {strides = array<i32>} : memref<8x16xf32, #tpu.memory_space<vmem>>, vector<8x16xf32>,
    return
  }
}

</mosaic_0001>

<bundles_post_ra>
// kernel: two_layer_net.1
= control target key start
LH: loop header
LB: loop body
LE: loop exit
PB: predicated region body
PF: predicated region fallthrough
CT: control target
= control target key end

     0   :  { %v286_v1 = vmov 0.0   ;;  %vm287_vm0 = vmmov 0   ;;  %s367_s0 = inlined_call_operand.vmem [shape: f32[8,64], index: 0, kind: input, shape index: {}]   ;;  %s368_s1 = inlined_call_operand.vmem [shape: f32[64,32], index: 1, kind: input, shape index: {}]   ;;  %s369_s2 = inlined_call_operand.vmem [shape: f32[1,32], index: 2, kind: input, shape index: {}]   ;;  %s370_s3 = inlined_call_operand.vmem [shape: f32[32,16], index: 3, kind: input, shape index: {}]   ;;  %s371_s4 = inlined_call_operand.vmem [shape: f32[1,16], index: 4, kind: input, shape index: {}]   ;;  %s372_s5 = inlined_call_operand.hbm [shape: f32[8,16], index: 5, kind: output, shape index: {}]  }
   0x1   :  { %v29_v0 = vld [vmem:[%s368_s1 + $0x38] sm:$0xff]  ;;  %231 = vmatprep.subr.mxu0 %v286_v1  ;;  %v28_v2 = vld [vmem:[%s368_s1 + $0x30] sm:$0xff]  ;;  %247 = vmatprep.mubr.msk.f32.mxu0 %vm287_vm0, %v286_v1  ;;  %v27_v3 = vld [vmem:[%s368_s1 + $0x28] sm:$0xff] }
   0x2   :  { %232 = vmatpush3.msra.mxu0 %v29_v0  ;;  %250 = vmatprep.subr.mxu1 %v286_v1  ;;  %v115_v4 = vld [vmem:[%s370_s3 + $0x18] sm:$0xff] }
   0x3   :  { %233 = vmatprep.subr.mxu0 %v286_v1  ;;  %258 = vmatprep.mubr.msk.f32.mxu1 %vm287_vm0, %v286_v1 }
   0x4   :  { %10 = vsyncpa [#allocation3], 0  ;;  %234 = vmatpush3.msra.mxu0 %v28_v2  ;;  %251 = vmatpush3.msra.mxu1 %v115_v4  ;;  %v26_v5 = vld [vmem:[%s368_s1 + $0x20] sm:$0xff]  ;;  %v25_v6 = vld [vmem:[%s368_s1 + $0x18] sm:$0xff]  ;;  %vm37_vm1 = vcmask 523264   ;;  %vm123_vm2 = vcmask 261120  }
   0x5   :  { %235 = vmatprep.subr.mxu0 %v286_v1  ;;  %252 = vmatprep.subr.mxu1 %v286_v1  ;;  %v24_v7 = vld [vmem:[%s368_s1 + $0x10] sm:$0xff]  ;;  %v23_v8 = vld [vmem:[%s368_s1 + $0x8] sm:$0xff]  ;;  %v22_v9 = vld [vmem:[%s368_s1] sm:$0xff]  ;;  %s288_s21 = smov [#allocation2]   ;;  %vm197_vm3 = vcmask 130048  }
   0x6   :  { %236 = vmatpush3.msra.mxu0 %v27_v3  ;;  %v21_v10 = vld [vmem:[%s367_s0] sm:$0xff]  ;;  %v114_v11 = vld [vmem:[%s370_s3 + $0x10] sm:$0xff]  ;;  %v113_v12 = vld [vmem:[%s370_s3 + $0x8] sm:$0xff]  ;;  %s205_s22 = sshll.u32 %s288_s21, 4  ;;  %s206_s22 = int_to_ptr.vmem [resolvable:$true] %s205_s22 }
   0x7   :  { %237 = vmatprep.subr.mxu0 %v286_v1  ;;  %253 = vmatpush3.msra.mxu1 %v114_v11  ;;  %v112_v13 = vld [vmem:[%s370_s3] sm:$0xff]  ;;  %s264_s3 = scalar_lea.vmem %s206_s22, 128  ;;  %p269_p1 = scmp.lt.s32.totalorder %s206_s22, %s206_s22 }
   0x8   :  { %238 = vmatpush3.msra.mxu0 %v26_v5  ;;  %254 = vmatprep.subr.mxu1 %v286_v1  ;;  %v213_v14 = vld [vmem:[%s369_s2] ss:$0 sm:$0xff]  ;;  %p265_p0 = scmp.ne.s32.totalorder %s206_s22, %s264_s3  ;;  %p270_p2 = scmp.lt.s32.totalorder %s264_s3, %s264_s3 }
   0x9   :  { %239 = vmatprep.subr.mxu0 %v286_v1  ;;  %255 = vmatpush3.msra.mxu1 %v113_v12  ;;  %v215_v19 = vld [vmem:[%s371_s4] ss:$0 sm:$0xff] }
   0xa   :  { %240 = vmatpush3.msra.mxu0 %v25_v6  ;;  %256 = vmatprep.subr.mxu1 %v286_v1  ;;  %p271_p3 = por %p270_p2, %p269_p1 }
   0xb   :  { %241 = vmatprep.subr.mxu0 %v286_v1  ;;  %257 = vmatpush3.msra.mxu1 %v112_v13 }
   0xc   :  { %242 = vmatpush3.msra.mxu0 %v24_v7  ;;  %p272_p4 = pnand %p271_p3, %p265_p0 }
   0xd   :  { %243 = vmatprep.subr.mxu0 %v286_v1 }
   0xe   :  { %244 = vmatpush3.msra.mxu0 %v23_v8 }
   0xf   :  { %245 = vmatprep.subr.mxu0 %v286_v1 }
  0x10   :  { %246 = vmatpush3.msra.mxu0 %v22_v9 }
  0x11   :  { %248 = vmatmul.mubr.msk.f32.vlgmr.msra.gmra.mxu0 %vm37_vm1, %v21_v10 }
  0xd1   :  { %v107_v15 = vpop.f32.mrf.mxu0 }
  0xd2   :  { %v108_v16 = vadd.f32 %v213_v14, %v107_v15 }
  0xd3   :  { %v249_v17 = vpop.f32.mrf.mxu0 }
  0xd4   :  { %v111_v18 = vmax.f32 %v108_v16, 0.0 }
  0xd6   :  { %259 = vmatmul.mubr.msk.f32.vlgmr.msra.gmra.mxu1 %vm123_vm2, %v111_v18 }
 0x196   :  { %v193_v20 = vpop.f32.mrf.mxu1 }
 0x197   :  { %v194_v21 = vadd.f32 %v215_v19, %v193_v20 }
 0x198   :  { %v260_v22 = vpop.f32.mrf.mxu1 }
 0x199   :  { %198 = vst.msk [vmem:[#allocation2] sm:$0xff] %vm197_vm3, %v194_v21 }
 0x19a   :  { %275 = shalt.err (!%p272_p4)
}
 0x19b   :  { %208 = dma.vmem_to_hbm [thread:$0]  %s206_s22, 128, %s372_s5, [#allocation3]  }
 0x19c   :  { %284 = dma.done.wait [#allocation3], 128  }
 0x19d   :  { %285 = vsyncadd [#allocation3], 4294967168 }
 0x19e   :  { %212 = vsyncpa [#allocation3], 1 }

</bundles_post_ra>
